<compile_context>
chip_gen: v5e
topology: v5e:2x2
jax: 0.10.0
libtpu: 0.0.40
codegen_flags: <defaults>
</compile_context>

<pallas_src>
import functools

import jax
import jax.numpy as jnp
from jax.experimental import pallas as pl
from jax.experimental.pallas import tpu as pltpu


def _gaussian_smooth_kernel(x_ref, sigma_ref, row_ref, col_ref, out_ref, *,
                            kernel_size, H, W):
    """One (batch, channel-tile) block per grid step, fully lane-dense.

    x_ref     : (1, ct, H*W)  input, spatial dims flattened onto the lane axis
    sigma_ref : (1, 1,  H*W)  per-pixel sigma (clamped > 0), shared over channels
    row_ref   : (1, 1,  H*W)  int32 row index of each flattened position
    col_ref   : (1, 1,  H*W)  int32 col index of each flattened position
    out_ref   : (1, ct, H*W)
    """
    _, ct, HW = out_ref.shape
    p = kernel_size // 2

    # TODO(synk): for bf16 inputs on v6e/v7x the tap sums could stay in bf16
    # (packed 16x128 vregs) with only the weight multiply in f32.
    x = x_ref[0].astype(jnp.float32)             # (ct, HW)
    sigma = sigma_ref[0].astype(jnp.float32)     # (1, HW)
    row = row_ref[0]                             # (1, HW) int32
    col = col_ref[0]                             # (1, HW) int32

    # ONE transcendental per pixel: e1**d2 == exp(-d2 / (2 sigma^2)).
    e1 = jnp.exp(-0.5 / (sigma * sigma))         # (1, HW)

    # Group the K*K taps by squared offset d2; taps in a group share one weight.
    groups = {}
    for oy in range(-p, p + 1):
        for ox in range(-p, p + 1):
            groups.setdefault(oy * oy + ox * ox, []).append((oy, ox))

    def shifted_tap(oy, ox):
        # Zero-padded translate by (oy, ox) in the flattened (lane) domain:
        # one static lane roll (XLU) + a border mask (VPU).  Note K^2 rolls total;
        # they are cheap XLU work, not relayout copies (the K^2 concern in 2-D).
        s = oy * W + ox
        t = x if s == 0 else pltpu.roll(x, shift=(-s) % HW, axis=1)
        m = None
        if oy > 0:
            m = row < (H - oy)
        elif oy < 0:
            m = row >= (-oy)
        if ox > 0:
            cm = col < (W - ox)
            m = cm if m is None else (m & cm)
        elif ox < 0:
            cm = col >= (-ox)
            m = cm if m is None else (m & cm)
        if m is not None:
            t = t * m.astype(jnp.float32)        # (1,HW) mask broadcasts over ct
        return t

    # Grouped accumulation with an on-demand running power (O(1) live planes).
    acc = None        # (ct, HW) weighted numerator
    wsum = None       # (1, HW)  analytic normalizer (pad taps counted, per spec)
    run_pow = None
    cur_d2 = 0
    for d2 in sorted(groups):
        taps = groups[d2]
        gsum = shifted_tap(*taps[0])
        for oy, ox in taps[1:]:
            gsum = gsum + shifted_tap(oy, ox)
        if d2 == 0:
            acc = gsum                                        # center weight is 1
            wsum = jnp.full((1, HW), float(len(taps)), dtype=jnp.float32)
        else:
            if run_pow is None:
                run_pow, cur_d2 = e1, 1
            while cur_d2 < d2:                                # raise by the delta
                run_pow = run_pow * e1
                cur_d2 += 1
            acc = acc + gsum * run_pow
            wsum = wsum + float(len(taps)) * run_pow

    # One reciprocal per pixel on the otherwise-idle EUP; one Newton step restores
    # exact-divide parity (wsum >= 1 always, so the approx path is safe).
    inv = pl.reciprocal(wsum, approx=True)
    inv = inv * (2.0 - wsum * inv)
    out_ref[0] = (acc * inv).astype(out_ref.dtype)


def _pick_channel_tile(C, HW, itemsize, c_block_bytes):
    """Whole C if it fits (hoists the sigma prologue out of the channel axis),
    else the largest multiple-of-8 divisor of C that fits the budget."""
    per_ch = max(1, HW * itemsize)
    if C * per_ch <= c_block_bytes:
        return C
    for ct in range(C - 1, 0, -1):
        if C % ct == 0 and ct % 8 == 0 and ct * per_ch <= c_block_bytes:
            return ct
    return C  # no legal smaller tile; raise vmem_limit_bytes if needed


def gaussian_smooth_pallas(x, sigma_map, kernel_size, *,
                           c_block_bytes=4 << 20, vmem_limit_bytes=None):
    """Spatially-adaptive Gaussian smoothing.  x: (B,C,H,W), sigma_map: (B,1,H,W).

    VMEM budget guidance: v7x (64 MiB physical) keep c_block_bytes ~2-4 MiB and
    vmem_limit_bytes <= ~48 MiB; v6e ~4-8 MiB blocks with an explicit 64-96 MiB
    limit; v5e set vmem_limit_bytes explicitly (scoped default is only 16 MiB).
    """
    B, C, H, W = x.shape
    if sigma_map.shape != (B, 1, H, W):
        raise ValueError(f"sigma_map shape {sigma_map.shape} != {(B, 1, H, W)}")
    HW = H * W

    # Lane-dense layout: flatten (H, W) onto the last (lane) axis.  These reshapes
    # are contiguous collapses in HBM (no data movement); the kernel never reshapes.
    x_flat = x.reshape(B, C, HW)
    sigma_flat = sigma_map.reshape(B, 1, HW)
    rows = jnp.broadcast_to(
        jnp.arange(H, dtype=jnp.int32)[:, None], (H, W)).reshape(1, 1, HW)
    cols = jnp.broadcast_to(
        jnp.arange(W, dtype=jnp.int32)[None, :], (H, W)).reshape(1, 1, HW)

    # TODO(synk): add an H-tiled path (p-row halo via Element-offset index_map or a
    # manual make_async_copy) for images where a full (ct, H*W) plane exceeds VMEM.
    ct = _pick_channel_tile(C, HW, x_flat.dtype.itemsize, c_block_bytes)
    n_c_tiles = C // ct

    kk = kernel_size * kernel_size
    cost = pl.CostEstimate(
        flops=int(2 * kk * B * C * HW),
        transcendentals=int(2 * B * n_c_tiles * HW),          # exp + rcp per pixel
        bytes_accessed=int(x_flat.dtype.itemsize * 2 * B * C * HW      # x + out
                           + 4 * B * n_c_tiles * HW                     # sigma re-reads
                           + 2 * 4 * B * n_c_tiles * HW),               # row/col planes
    )
    cparams = dict(dimension_semantics=("parallel", "parallel"))
    if vmem_limit_bytes is not None:
        cparams["vmem_limit_bytes"] = int(vmem_limit_bytes)

    kernel = functools.partial(_gaussian_smooth_kernel,
                               kernel_size=kernel_size, H=H, W=W)
    out_flat = pl.pallas_call(
        kernel,
        out_shape=jax.ShapeDtypeStruct((B, C, HW), x.dtype),
        grid=(B, n_c_tiles),
        in_specs=[
            pl.BlockSpec((1, ct, HW), lambda b, c: (b, c, 0)),   # x
            pl.BlockSpec((1, 1, HW), lambda b, c: (b, 0, 0)),    # sigma (per batch)
            pl.BlockSpec((1, 1, HW), lambda b, c: (0, 0, 0)),    # row index plane
            pl.BlockSpec((1, 1, HW), lambda b, c: (0, 0, 0)),    # col index plane
        ],
        out_specs=pl.BlockSpec((1, ct, HW), lambda b, c: (b, c, 0)),
        compiler_params=pltpu.CompilerParams(**cparams),
        cost_estimate=cost,
    )(x_flat, sigma_flat, rows, cols)
    return out_flat.reshape(B, C, H, W)


def gaussian_smooth_reference(x, sigma_map, kernel_size):
    """Pure-JAX reference of the same forward semantics (validation only)."""
    p = kernel_size // 2
    H, W = x.shape[2], x.shape[3]
    xp = jnp.pad(x, ((0, 0), (0, 0), (p, p), (p, p)))
    inv2s2 = 0.5 / (sigma_map * sigma_map)
    acc = jnp.zeros_like(x)
    wsum = jnp.zeros_like(sigma_map)
    for dy in range(kernel_size):
        for dx in range(kernel_size):
            d2 = float((dy - p) ** 2 + (dx - p) ** 2)
            w = jnp.exp(-d2 * inv2s2)
            wsum = wsum + w
            acc = acc + xp[:, :, dy:dy + H, dx:dx + W] * w
    return acc / wsum


class BasicGaussianSmoothFunctorPallas:
    """JAX/Pallas port of BasicGaussianSmoothFunctor (forward only)."""

    def __init__(self, kernel_size, vmem_limit_bytes=None, c_block_bytes=4 << 20):
        self.kernel_size = kernel_size
        self.pad = kernel_size // 2
        self.vmem_limit_bytes = vmem_limit_bytes
        self.c_block_bytes = c_block_bytes
        # TODO(synk): AdaptiveSigmoid's definition / learned parameters are not in
        # the source; using a deterministic sigma = scale * sigmoid(a*x + b).
        self.sigmoid_scale = jnp.float32(3.0)
        self.sigmoid_slope = jnp.float32(1.0)
        self.sigmoid_bias = jnp.float32(0.0)

    def _adaptive_sigmoid(self, perspective):
        return self.sigmoid_scale * jax.nn.sigmoid(
            self.sigmoid_slope * perspective + self.sigmoid_bias)

    def sigma_map(self, perspective):
        return jnp.maximum(self._adaptive_sigmoid(perspective), 1e-4)

    def __call__(self, x, perspective):
        sigma = self.sigma_map(perspective)
        return gaussian_smooth_pallas(
            x, sigma, self.kernel_size,
            c_block_bytes=self.c_block_bytes,
            vmem_limit_bytes=self.vmem_limit_bytes)


if __name__ == "__main__":
    key = jax.random.PRNGKey(0)
    kx, kp = jax.random.split(key)

    B, C, H, W = 2, 4, 16, 16
    kernel_size = 3

    x = jax.random.normal(kx, (B, C, H, W), dtype=jnp.float32)
    perspective = jax.random.normal(kp, (B, 1, H, W), dtype=jnp.float32)

    module = BasicGaussianSmoothFunctorPallas(kernel_size)
    out = module(x, perspective)
    jax.block_until_ready(out)

    ref = gaussian_smooth_reference(x, module.sigma_map(perspective), kernel_size)
    assert out.shape == (B, C, H, W)
    assert bool(jnp.allclose(out, ref, rtol=1e-3, atol=1e-3)), "mismatch vs. reference"
    print("KERNEL_OK")
</pallas_src>

<mosaic_0001>
module attributes {stable_mosaic.version = 11 : i64} {
  func.func @_gaussian_smooth_kernel(%arg0: i32, %arg1: i32, %arg2: memref<1x4x256xf32, #tpu.memory_space<vmem>>, %arg3: memref<1x1x256xf32, #tpu.memory_space<vmem>>, %arg4: memref<1x1x256xi32, #tpu.memory_space<vmem>>, %arg5: memref<1x1x256xi32, #tpu.memory_space<vmem>>, %arg6: memref<1x4x256xf32, #tpu.memory_space<vmem>>) attributes {dimension_semantics = [#tpu.dimension_semantics<parallel>, #tpu.dimension_semantics<parallel>], iteration_bounds = array<i64: 2, 1>, scalar_prefetch = 0 : i64, scratch_operands = 0 : i64, tpu.core_type = #tpu.core_type<tc>, window_params = [{transform_indices = @transform_0, window_bounds = array<i64: 1, 4, 256>}, {transform_indices = @transform_1, window_bounds = array<i64: 1, 1, 256>}, {pipeline_mode = #tpu.pipeline_mode<synchronous>, transform_indices = @transform_2, window_bounds = array<i64: 1, 1, 256>}, {pipeline_mode = #tpu.pipeline_mode<synchronous>, transform_indices = @transform_3, window_bounds = array<i64: 1, 1, 256>}, {transform_indices = @transform_4, window_bounds = array<i64: 1, 4, 256>}]} {
    %c0 = arith.constant 0 : index
    %c0_0 = arith.constant 0 : index
    %c0_1 = arith.constant 0 : index
    %0 = vector.load %arg2[%c0, %c0_0, %c0_1] : memref<1x4x256xf32, #tpu.memory_space<vmem>>, vector<1x4x256xf32>
    %1 = vector.shape_cast %0 : vector<1x4x256xf32> to vector<4x256xf32>
    %c0_2 = arith.constant 0 : index
    %c0_3 = arith.constant 0 : index
    %c0_4 = arith.constant 0 : index
    %2 = vector.load %arg3[%c0_2, %c0_3, %c0_4] : memref<1x1x256xf32, #tpu.memory_space<vmem>>, vector<1x1x256xf32>
    %3 = vector.shape_cast %2 : vector<1x1x256xf32> to vector<1x256xf32>
    %c0_5 = arith.constant 0 : index
    %c0_6 = arith.constant 0 : index
    %c0_7 = arith.constant 0 : index
    %4 = vector.load %arg4[%c0_5, %c0_6, %c0_7] : memref<1x1x256xi32, #tpu.memory_space<vmem>>, vector<1x1x256xi32>
    %5 = vector.shape_cast %4 : vector<1x1x256xi32> to vector<1x256xi32>
    %c0_8 = arith.constant 0 : index
    %c0_9 = arith.constant 0 : index
    %c0_10 = arith.constant 0 : index
    %6 = vector.load %arg5[%c0_8, %c0_9, %c0_10] : memref<1x1x256xi32, #tpu.memory_space<vmem>>, vector<1x1x256xi32>
    %7 = vector.shape_cast %6 : vector<1x1x256xi32> to vector<1x256xi32>
    %8 = arith.mulf %3, %3 : vector<1x256xf32>
    %cst = arith.constant -5.000000e-01 : f32
    %9 = vector.broadcast %cst : f32 to vector<1x256xf32>
    %10 = arith.divf %9, %8 : vector<1x256xf32>
    %11 = math.exp %10 : vector<1x256xf32>
    %cst_11 = arith.constant 1.000000e+00 : f32
    %12 = vector.broadcast %cst_11 : f32 to vector<1x256xf32>
    %c16_i32 = arith.constant 16 : i32
    %13 = tpu.dynamic_rotate %1 by %c16_i32 dim 1 : vector<4x256xf32>, i32 -> vector<4x256xf32>
    %c1_i32 = arith.constant 1 : i32
    %14 = vector.broadcast %c1_i32 : i32 to vector<1x256xi32>
    %15 = arith.cmpi sge, %5, %14 : vector<1x256xi32>
    %16 = arith.extui %15 : vector<1x256xi1> to vector<1x256xi32>
    %17 = arith.sitofp %16 : vector<1x256xi32> to vector<1x256xf32>
    %18 = vector.broadcast %17 : vector<1x256xf32> to vector<4x256xf32>
    %19 = arith.mulf %13, %18 : vector<4x256xf32>
    %c1_i32_12 = arith.constant 1 : i32
    %20 = tpu.dynamic_rotate %1 by %c1_i32_12 dim 1 : vector<4x256xf32>, i32 -> vector<4x256xf32>
    %c1_i32_13 = arith.constant 1 : i32
    %21 = vector.broadcast %c1_i32_13 : i32 to vector<1x256xi32>
    %22 = arith.cmpi sge, %7, %21 : vector<1x256xi32>
    %23 = arith.extui %22 : vector<1x256xi1> to vector<1x256xi32>
    %24 = arith.sitofp %23 : vector<1x256xi32> to vector<1x256xf32>
    %25 = vector.broadcast %24 : vector<1x256xf32> to vector<4x256xf32>
    %26 = arith.mulf %20, %25 : vector<4x256xf32>
    %27 = arith.addf %19, %26 : vector<4x256xf32>
    %c255_i32 = arith.constant 255 : i32
    %28 = tpu.dynamic_rotate %1 by %c255_i32 dim 1 : vector<4x256xf32>, i32 -> vector<4x256xf32>
    %c15_i32 = arith.constant 15 : i32
    %29 = vector.broadcast %c15_i32 : i32 to vector<1x256xi32>
    %30 = arith.cmpi slt, %7, %29 : vector<1x256xi32>
    %31 = arith.extui %30 : vector<1x256xi1> to vector<1x256xi32>
    %32 = arith.sitofp %31 : vector<1x256xi32> to vector<1x256xf32>
    %33 = vector.broadcast %32 : vector<1x256xf32> to vector<4x256xf32>
    %34 = arith.mulf %28, %33 : vector<4x256xf32>
    %35 = arith.addf %27, %34 : vector<4x256xf32>
    %c240_i32 = arith.constant 240 : i32
    %36 = tpu.dynamic_rotate %1 by %c240_i32 dim 1 : vector<4x256xf32>, i32 -> vector<4x256xf32>
    %c15_i32_14 = arith.constant 15 : i32
    %37 = vector.broadcast %c15_i32_14 : i32 to vector<1x256xi32>
    %38 = arith.cmpi slt, %5, %37 : vector<1x256xi32>
    %39 = arith.extui %38 : vector<1x256xi1> to vector<1x256xi32>
    %40 = arith.sitofp %39 : vector<1x256xi32> to vector<1x256xf32>
    %41 = vector.broadcast %40 : vector<1x256xf32> to vector<4x256xf32>
    %42 = arith.mulf %36, %41 : vector<4x256xf32>
    %43 = arith.addf %35, %42 : vector<4x256xf32>
    %44 = vector.broadcast %11 : vector<1x256xf32> to vector<4x256xf32>
    %45 = arith.mulf %43, %44 : vector<4x256xf32>
    %46 = arith.addf %1, %45 : vector<4x256xf32>
    %cst_15 = arith.constant 4.000000e+00 : f32
    %47 = vector.broadcast %cst_15 : f32 to vector<1x256xf32>
    %48 = arith.mulf %47, %11 : vector<1x256xf32>
    %49 = arith.addf %12, %48 : vector<1x256xf32>
    %c17_i32 = arith.constant 17 : i32
    %50 = tpu.dynamic_rotate %1 by %c17_i32 dim 1 : vector<4x256xf32>, i32 -> vector<4x256xf32>
    %c1_i32_16 = arith.constant 1 : i32
    %51 = vector.broadcast %c1_i32_16 : i32 to vector<1x256xi32>
    %52 = arith.cmpi sge, %5, %51 : vector<1x256xi32>
    %c1_i32_17 = arith.constant 1 : i32
    %53 = vector.broadcast %c1_i32_17 : i32 to vector<1x256xi32>
    %54 = arith.cmpi sge, %7, %53 : vector<1x256xi32>
    %55 = arith.andi %52, %54 : vector<1x256xi1>
    %56 = arith.extui %55 : vector<1x256xi1> to vector<1x256xi32>
    %57 = arith.sitofp %56 : vector<1x256xi32> to vector<1x256xf32>
    %58 = vector.broadcast %57 : vector<1x256xf32> to vector<4x256xf32>
    %59 = arith.mulf %50, %58 : vector<4x256xf32>
    %c15_i32_18 = arith.constant 15 : i32
    %60 = tpu.dynamic_rotate %1 by %c15_i32_18 dim 1 : vector<4x256xf32>, i32 -> vector<4x256xf32>
    %c1_i32_19 = arith.constant 1 : i32
    %61 = vector.broadcast %c1_i32_19 : i32 to vector<1x256xi32>
    %62 = arith.cmpi sge, %5, %61 : vector<1x256xi32>
    %c15_i32_20 = arith.constant 15 : i32
    %63 = vector.broadcast %c15_i32_20 : i32 to vector<1x256xi32>
    %64 = arith.cmpi slt, %7, %63 : vector<1x256xi32>
    %65 = arith.andi %62, %64 : vector<1x256xi1>
    %66 = arith.extui %65 : vector<1x256xi1> to vector<1x256xi32>
    %67 = arith.sitofp %66 : vector<1x256xi32> to vector<1x256xf32>
    %68 = vector.broadcast %67 : vector<1x256xf32> to vector<4x256xf32>
    %69 = arith.mulf %60, %68 : vector<4x256xf32>
    %70 = arith.addf %59, %69 : vector<4x256xf32>
    %c241_i32 = arith.constant 241 : i32
    %71 = tpu.dynamic_rotate %1 by %c241_i32 dim 1 : vector<4x256xf32>, i32 -> vector<4x256xf32>
    %c15_i32_21 = arith.constant 15 : i32
    %72 = vector.broadcast %c15_i32_21 : i32 to vector<1x256xi32>
    %73 = arith.cmpi slt, %5, %72 : vector<1x256xi32>
    %c1_i32_22 = arith.constant 1 : i32
    %74 = vector.broadcast %c1_i32_22 : i32 to vector<1x256xi32>
    %75 = arith.cmpi sge, %7, %74 : vector<1x256xi32>
    %76 = arith.andi %73, %75 : vector<1x256xi1>
    %77 = arith.extui %76 : vector<1x256xi1> to vector<1x256xi32>
    %78 = arith.sitofp %77 : vector<1x256xi32> to vector<1x256xf32>
    %79 = vector.broadcast %78 : vector<1x256xf32> to vector<4x256xf32>
    %80 = arith.mulf %71, %79 : vector<4x256xf32>
    %81 = arith.addf %70, %80 : vector<4x256xf32>
    %c239_i32 = arith.constant 239 : i32
    %82 = tpu.dynamic_rotate %1 by %c239_i32 dim 1 : vector<4x256xf32>, i32 -> vector<4x256xf32>
    %c15_i32_23 = arith.constant 15 : i32
    %83 = vector.broadcast %c15_i32_23 : i32 to vector<1x256xi32>
    %84 = arith.cmpi slt, %5, %83 : vector<1x256xi32>
    %c15_i32_24 = arith.constant 15 : i32
    %85 = vector.broadcast %c15_i32_24 : i32 to vector<1x256xi32>
    %86 = arith.cmpi slt, %7, %85 : vector<1x256xi32>
    %87 = arith.andi %84, %86 : vector<1x256xi1>
    %88 = arith.extui %87 : vector<1x256xi1> to vector<1x256xi32>
    %89 = arith.sitofp %88 : vector<1x256xi32> to vector<1x256xf32>
    %90 = vector.broadcast %89 : vector<1x256xf32> to vector<4x256xf32>
    %91 = arith.mulf %82, %90 : vector<4x256xf32>
    %92 = arith.addf %81, %91 : vector<4x256xf32>
    %93 = arith.mulf %11, %11 : vector<1x256xf32>
    %94 = vector.broadcast %93 : vector<1x256xf32> to vector<4x256xf32>
    %95 = arith.mulf %92, %94 : vector<4x256xf32>
    %96 = arith.addf %46, %95 : vector<4x256xf32>
    %cst_25 = arith.constant 4.000000e+00 : f32
    %97 = vector.broadcast %cst_25 : f32 to vector<1x256xf32>
    %98 = arith.mulf %97, %93 : vector<1x256xf32>
    %99 = arith.addf %49, %98 : vector<1x256xf32>
    %100 = tpu.reciprocal %99 {approx = true} : vector<1x256xf32> -> vector<1x256xf32>
    %101 = arith.mulf %99, %100 : vector<1x256xf32>
    %cst_26 = arith.constant 2.000000e+00 : f32
    %102 = vector.broadcast %cst_26 : f32 to vector<1x256xf32>
    %103 = arith.subf %102, %101 : vector<1x256xf32>
    %104 = arith.mulf %100, %103 : vector<1x256xf32>
    %105 = vector.broadcast %104 : vector<1x256xf32> to vector<4x256xf32>
    %106 = arith.mulf %96, %105 : vector<4x256xf32>
    %c0_27 = arith.constant 0 : index
    %c0_28 = arith.constant 0 : index
    %c0_29 = arith.constant 0 : index
    %107 = vector.load %arg6[%c0_27, %c0_28, %c0_29] : memref<1x4x256xf32, #tpu.memory_space<vmem>>, vector<1x4x256xf32>
    %108 = vector.shape_cast %107 : vector<1x4x256xf32> to vector<4x256xf32>
    %109 = vector.shape_cast %106 : vector<4x256xf32> to vector<1x4x256xf32>
    tpu.vector_store %arg6[%c0_27, %c0_28, %c0_29], %109 {strides = array<i32>} : memref<1x4x256xf32, #tpu.memory_space<vmem>>, vector<1x4x256xf32>,
    return
  }
  func.func @transform_0(%arg0: i32, %arg1: i32) -> (i32, i32, i32) {
    %c0_i32 = arith.constant 0 : i32
    %c0_i32_0 = arith.constant 0 : i32
    return %arg0, %arg1, %c0_i32 : i32, i32, i32
  }
  func.func @transform_1(%arg0: i32, %arg1: i32) -> (i32, i32, i32) {
    %c0_i32 = arith.constant 0 : i32
    %c0_i32_0 = arith.constant 0 : i32
    %c0_i32_1 = arith.constant 0 : i32
    return %arg0, %c0_i32, %c0_i32_0 : i32, i32, i32
  }
  func.func @transform_2(%arg0: i32, %arg1: i32) -> (i32, i32, i32) {
    %c0_i32 = arith.constant 0 : i32
    %c0_i32_0 = arith.constant 0 : i32
    %c0_i32_1 = arith.constant 0 : i32
    %c0_i32_2 = arith.constant 0 : i32
    return %c0_i32, %c0_i32_0, %c0_i32_1 : i32, i32, i32
  }
  func.func @transform_3(%arg0: i32, %arg1: i32) -> (i32, i32, i32) {
    %c0_i32 = arith.constant 0 : i32
    %c0_i32_0 = arith.constant 0 : i32
    %c0_i32_1 = arith.constant 0 : i32
    %c0_i32_2 = arith.constant 0 : i32
    return %c0_i32, %c0_i32_0, %c0_i32_1 : i32, i32, i32
  }
  func.func @transform_4(%arg0: i32, %arg1: i32) -> (i32, i32, i32) {
    %c0_i32 = arith.constant 0 : i32
    %c0_i32_0 = arith.constant 0 : i32
    return %arg0, %arg1, %c0_i32 : i32, i32, i32
  }
}

</mosaic_0001>

<bundles_post_ra>
// kernel: tpu_custom_call.1
= control target key start
LH: loop header
LB: loop body
LE: loop exit
PB: predicated region body
PF: predicated region fallthrough
CT: control target
= control target key end

     0   :  { %s1286_s0 = inlined_call_operand.hbm [shape: f32[2,4,256], index: 0, kind: input, shape index: {}]   ;;  %s1287_s1 = inlined_call_operand.hbm [shape: f32[2,1,256], index: 1, kind: input, shape index: {}]   ;;  %s1288_s2 = inlined_call_operand.hbm [shape: s32[1,1,256], index: 2, kind: input, shape index: {}]   ;;  %s1289_s3 = inlined_call_operand.vmem [shape: s32[1,1,256], index: 3, kind: input, shape index: {}]   ;;  %s1290_s4 = inlined_call_operand.hbm [shape: f32[2,4,256], index: 4, kind: output, shape index: {}]  }
   0x1   :  { %1295 = sst [smem:[#allocation18_spill]] %s1288_s2 }
   0x2   :  { %9 = vsyncpa [#allocation3], 0 }
   0x3   :  { %11 = vsyncpa [#allocation3 + $0x1], 0 }
   0x4   :  { %12 = vsyncpa [#allocation6], 0 }
   0x5   :  { %14 = vsyncpa [#allocation6 + $0x1], 0 }
   0x6   :  { %15 = vsyncpa [#allocation4], 0 }
   0x7   :  { %17 = vsyncpa [#allocation4 + $0x1], 0  ;;  %s1019_s15 = smov 0   ;;  %s1021_s16 = smov 0  }
   0x8   :  { %s1023_s17 = smov 0   ;;  %s1025_s18 = smov 0  }
   0x9   :  { %s1027_s19 = smov 0   ;;  %s1029_s20 = smov 0  }
   0xa LB: > { %1296 = sst [smem:[#allocation13_spill]] %s962_s15  ;;  %s1050_s21 = sadd.s32 4294967295, %s982_s20   ;;  %s982_s20 = sphi %s1029_s20, %s23_s20   ;;  %s978_s19 = sphi %s1027_s19, %s1315_s19   ;;  %s974_s18 = sphi %s1025_s18, %s1314_s18   ;;  %s970_s17 = sphi %s1023_s17, %s1310_s17   ;;  %s966_s16 = sphi %s1021_s16, %s1313_s16   ;;  %s962_s15 = sphi %s1019_s15, %s1312_s15  }
   0xb   : > { %1297 = sst [smem:[#allocation14_spill]] %s970_s17  ;;  %s680_s22 = sadd.s32 4294967294, %s982_s20  }
   0xc   : > { %p57_p0 = scmp.ne.s32.totalorder %s966_s16, %s962_s15  ;;  %p58_p1 = scmp.eq.s32.totalorder %s1050_s21, 0 }
   0xd   : > { %p151_p2 = scmp.eq.s32.totalorder %s1050_s21, 1  ;;  %p157_p3 = scmp.eq.s32.totalorder %s680_s22, 1 }
   0xe   : > { %p1059_p4 = por %p58_p1, %p57_p0  ;;  %p681_p5 = scmp.ge.s32.totalorder %s982_s20, 1 }
   0xf   : > { %p1064_p6 = por %p157_p3, %p57_p0  ;;  %p164_p7 = scmp.lt.s32.totalorder %s982_s20, 3 }
  0x10   : > { %s1301_s2 = sld [smem:[#allocation18_spill]]  ;;  %p683_p9 = scmp.ge.s32.totalorder %s982_s20, 2 }
  0x11   : > { %s1299_s24 = scalar_select %p1064_p6, 1, 0 }
  0x12   : > { %p1072_p8 = pnand %p681_p5, %p164_p7  ;;  %s984_s29 = smov [#allocation7]  }
  0x13   : > { %1300 = sst [smem:[#allocation15_spill]] %s1299_s24  ;;  %s178_s30 = sshll.u32 %s984_s29, 4  ;;  %s179_s30 = int_to_ptr.vmem [resolvable:$true] %s178_s30 }
  0x14   : > { %p719_p10 = pneg %p1072_p8  ;;  %s35_s5 = sadd.s32 1, %s978_s19 }
  0x15   : > { %p37_p12 = scmp.ge.s32.totalorder %s35_s5, 2  ;;  %s44_s6 = sadd.s32 1, %s970_s17 }
  0x16   : > { %s176_s27 = sshll.u32 %s1301_s2, 4  ;;  %p720_p11 = pnand %p719_p10, %p58_p1  ;;  %s177_s27 = int_to_ptr.hbm [resolvable:$true] %s176_s27 }
  0x17   : > { %p51_p13 = scmp.ne.s32.totalorder %s970_s17, %s966_s16  ;;  %p52_p0 = scmp.eq.s32.totalorder %s982_s20, 0 }
  0x18   : > { %722 = dma.hbm_to_vmem [thread:$0]  (!%p720_p11), %s177_s27, 32, %s179_s30, [#allocation6]  }
  0x19   : > { %s1317_s5 = smov (%p37_p12, %s35_s5), 0  ;;  %p1088_p3 = por %p52_p0, %p51_p13 }
  0x1a   : > { %1303 = sst [smem:[#allocation16_spill]] %s1317_s5  ;;  %p1094_p5 = por %p151_p2, %p51_p13 }
  0x1b   : > { %s39_s9 = ssub.s32 %s978_s19, %s1317_s5  ;;  %p735_p7 = scmp.lt.s32.totalorder %s982_s20, 2 }
  0x1c   : > { %p42_p10 = scmp.eq.s32.totalorder %s39_s9, 0  ;;  %s192_s10 = sand.u32 1, %s970_s17  }
  0x1d   : > { %s684_s11 = sshll.u32 %s192_s10, 3  ;;  %s707_s13 = sshll.u32 %s978_s19, 3 }
  0x1e   : > { %s1103_s12 = scalar_select %p42_p10, %s970_s17, %s44_s6  }
  0x1f   : > { %s203_s25 = scalar_lea.hbm %s1286_s0, %s707_s13  ;;  %s196_s26 = scalar_lea.vmem [#allocation2], %s684_s11 }
  0x20   : > { %1306 = sst [smem:[#allocation17_spill]] %s1103_s12  ;;  %s207_s27 = sshll.u32 %s196_s26, 4  ;;  %s208_s27 = int_to_ptr.vmem [resolvable:$true] %s207_s27 }
  0x21   : > { %s205_s29 = sshll.u32 %s203_s25, 4  ;;  %p724_p2 = pnand %p735_p7, %p1088_p3  ;;  %s206_s29 = int_to_ptr.hbm [resolvable:$true] %s205_s29 }
  0x22   : > { %s214_s30 = sand.u32 1, %s982_s20   ;;  %s687_s2 = sshll.u32 %s192_s10, 1 }
  0x23   : > { %s193_s9 = scalar_lea.sflag [#allocation3], %s192_s10  ;;  %s688_s5 = sshll.u32 %s978_s19, 1 }
  0x24   : > { %726 = dma.hbm_to_vmem [thread:$0]  (!%p724_p2), %s206_s29, 128, %s208_s27, %s193_s9  }
  0x25   : > { %s222_s12 = scalar_lea.hbm %s1287_s1, %s688_s5  ;;  %s218_s17 = scalar_lea.vmem [#allocation5], %s687_s2 }
  0x26   : > { %s226_s15 = sshll.u32 %s218_s17, 4  ;;  %s224_s14 = sshll.u32 %s222_s12, 4  ;;  %s227_s15 = int_to_ptr.vmem [resolvable:$true] %s226_s15  ;;  %s225_s14 = int_to_ptr.hbm [resolvable:$true] %s224_s14 }
  0x27   : > { %s215_s11 = scalar_lea.sflag [#allocation6], %s214_s30  ;;  %235 = sbr.rel (%p1072_p8) target bundleno = 247 (0xf7), region = 36 }
  0x28   : > { %729 = dma.hbm_to_vmem [thread:$0]  (!%p724_p2), %s225_s14, 32, %s227_s15, %s215_s11  }
  0x29   : > { %s1119_s7 = sand.u32 (!%p1072_p8), 1, %s966_s16  }
  0x2a   : > { %s690_s10 = sshll.u32 (!%p1072_p8), %s1119_s7, 3  ;;  %s238_s24 = scalar_lea.sflag (!%p1072_p8), [#allocation3], %s1119_s7 }
  0x2b   : > { %s241_s2 = scalar_lea.vmem (!%p1072_p8), [#allocation2], %s690_s10 }
  0x2c   : > { %945 = dma.done.wait (%p1059_p4), %s238_s24, 128  }
  0x2d   : > { %947 = vsyncadd (%p1059_p4), %s238_s24, 4294967168  ;;  %s247_s15 = sand.u32 1, %s1050_s21   ;;  %s691_s17 = sshll.u32 %s1119_s7, 1 }
  0x2e   : > { %s248_s28 = scalar_lea.sflag [#allocation6], %s247_s15  ;;  %s1131_s5 = scalar_lea.vmem [#allocation5], %s691_s17 }
  0x2f   : > { %949 = dma.done.wait (%p1059_p4), %s248_s28, 32  }
  0x30   : > { %951 = vsyncadd (%p1059_p4), %s248_s28, 4294967264 }
  0x31   : > { %953 = dma.done.wait (%p58_p1), [#allocation6], 32  }
  0x32   : > { %955 = vsyncadd (%p58_p1), [#allocation6], 4294967264  ;;  %v1141_v0 = vld [vmem:[%s241_s2] sm:$0xff]  ;;  %s985_s12 = smov 16   ;;  %s986_s23 = smov 1   ;;  %v319_v39 = vlaneseq  ;;  %v993_v47 = vmov 0.0  }
  0x33   : > { %310 = vst [vmem:[#allocation1] ss:$2 sm:$0xff] %v1141_v0  ;;  %s987_s21 = smov 127   ;;  %s988_s13 = smov 112   ;;  %v288_v17 = vld [vmem:[%s1131_s5] sm:$0x3] }
  0x34   : > { %s989_s22 = smov 17   ;;  %s990_s25 = smov 15   ;;  %v291_v18 = vmul.f32 %v288_v17, %v288_v17  ;;  %v1159_v40 = vld [vmem:[#allocation7] sm:$0x3]  ;;  %v1164_v41 = vld [vmem:[%s1289_s3] sm:$0x3] }
  0x35   : > { %s991_s26 = smov 113   ;;  %s992_s27 = smov 111   ;;  %v1167_v45 = vand.u32 127, %v319_v39  ;;  %vm324_vm4 = vcmp.ge.s32.totalorder %v1159_v40, 1  ;;  %vm346_vm5 = vcmp.ge.s32.totalorder %v1164_v41, 1  ;;  %vm370_vm6 = vcmp.lt.s32.totalorder %v1164_v41, 15 }
  0x36   : > { %796 = vrcp.f32 %v291_v18  ;;  %vm297_vm0 = vweird.f32 %v291_v18  ;;  %v303_v23 = vand.u32 2147483648, %v291_v18  ;;  %v301_v25 = vand.u32 2147483647, %v291_v18  ;;  %vm434_vm12 = vmand %vm324_vm4, %vm346_vm5  ;;  %s708_s9 = sshll.u32 %s974_s18, 3  ;;  %s286_s24 = scalar_lea.vmem [#allocation8], %s690_s10 }
  0x37   : > { %v694_v48 = vsel %vm324_vm4, 1.0, %v993_v47  ;;  %v695_v49 = vsel %vm346_vm5, 1.0, %v993_v47  ;;  %vm321_vm7 = vcmp.lt.s32.totalorder %v1167_v45, 16  ;;  %vm343_vm8 = vcmp.lt.s32.totalorder %v1167_v45, 1  ;;  %vm456_vm13 = vmand %vm324_vm4, %vm370_vm6  ;;  %s558_s11 = scalar_lea.hbm %s1290_s4, %s708_s9  ;;  %s560_s2 = sshll.u32 %s286_s24, 4  ;;  %s561_s2 = int_to_ptr.vmem [resolvable:$true] %s560_s2 }
  0x38   : > { %v304_v26 = vor.u32 1.1754944e-38, %v303_v23  ;;  %vm302_vm3 = vcmp.eq.f32.partialorder %v301_v25, 8.507059e+37  ;;  %v329_v52 = vperm.slane %v694_v48, 1  ;;  %v351_v53 = vperm.slane %v695_v49, 1  ;;  %s562_s18 = sshll.u32 %s558_s11, 4  ;;  %s545_s15 = scalar_lea.sflag [#allocation4], %s1119_s7  ;;  %s563_s18 = int_to_ptr.hbm [resolvable:$true] %s562_s18 }
  0x39   : > { %v696_v54 = vsel %vm370_vm6, 1.0, %v993_v47  ;;  %vm394_vm9 = vcmp.lt.s32.totalorder %v1159_v40, 15  ;;  %v328_v57 = vperm.slane %v694_v48, 0  ;;  %vm367_vm10 = vcmp.lt.s32.totalorder %v1167_v45, 127  ;;  %s906_s17 = sshra.s32 %s563_s18, 4  ;;  %s907_s17 = int_to_ptr.hbm [resolvable:$true] %s906_s17 }
  0x3a   : > { %v311_v1 = vld.sshfl [vmem:[#allocation1] sm:$0xff pattern:$0x75316420]  ;;  %v312_v2 = vld.sshfl [vmem:[#allocation1 + $0x8] sm:$0xff pattern:$0x75316420]  ;;  %vm480_vm14 = vmand %vm394_vm9, %vm346_vm5  ;;  %p913_p11 = scmp.lt.s32.totalorder %s907_s17, %s1290_s4 }
  0x3b   : > { %315 = vrot.lane.b32.xlu0 %v311_v1, %s985_s12  ;;  %334 = vst [vmem:[#allocation1] ss:$2 sm:$0xff] %v1141_v0  ;;  %v350_v58 = vperm.slane %v695_v49, 0  ;;  %v375_v59 = vperm.slane %v696_v54, 1  ;;  %vm391_vm11 = vcmp.lt.s32.totalorder %v1167_v45, 112  ;;  %v697_v61 = vsel %vm394_vm9, 1.0, %v993_v47 }
  0x3c   : > { %v797_v19 = vpop.eup %796  ;;  %vm431_vm15 = vcmp.lt.s32.totalorder %v1167_v45, 17  ;;  %vm416_vm4 = vcmask 1043456   ;;  %s908_s28 = scalar_lea.hbm %s907_s17, 8 }
  0x3d   : > { %v293_v20 = vmul.f32 %v797_v19, %v291_v18  ;;  %vm298_vm1 = vweird.f32 %v797_v19  ;;  %p909_p1 = scmp.ne.s32.totalorder %s907_s17, %s908_s28 }
  0x3e   : > { %vm299_vm2 = vmor %vm297_vm0, %vm298_vm1  ;;  %vm453_vm0 = vcmp.lt.s32.totalorder %v1167_v45, 15 }
  0x3f   : > { %v294_v21 = vsub.f32 1.0, %v293_v20  ;;  %vm504_vm1 = vmand %vm394_vm9, %vm370_vm6  ;;  %p910_p4 = pnand %p909_p1, %p1094_p5 }
  0x40   : > { %v701_v41 = vsel %vm504_vm1, 1.0, %v993_v47 }
  0x41   : > { %v295_v22 = vmul.f32 %v797_v19, %v294_v21  ;;  %p911_p8 = pneg %p910_p4 }
  0x42   : > { %v335_v3 = vld.sshfl [vmem:[#allocation1] sm:$0xff pattern:$0x75316420]  ;;  %v336_v4 = vld.sshfl [vmem:[#allocation1 + $0x8] sm:$0xff pattern:$0x75316420] }
  0x43   : > { %339 = vrot.lane.b32.xlu1 %v335_v3, %s986_s23  ;;  %317 = vrot.lane.b32.xlu0 %v312_v2, %s985_s12  ;;  %358 = vst [vmem:[#allocation1] ss:$2 sm:$0xff] %v1141_v0  ;;  %v296_v24 = vadd.f32 %v797_v19, %v295_v22 }
  0x45   : > { %v300_v27 = vsel %vm299_vm2, %v797_v19, %v296_v24  ;;  %v699_v19 = vsel %vm456_vm13, 1.0, %v993_v47  ;;  %vm477_vm2 = vcmp.lt.s32.totalorder %v1167_v45, 113 }
  0x46   : > { %v305_v28 = vsel %vm302_vm3, %v304_v26, %v300_v27  ;;  %v700_v27 = vsel %vm480_vm14, 1.0, %v993_v47  ;;  %vm501_vm3 = vcmp.lt.s32.totalorder %v1167_v45, 111 }
  0x47   : > { %v306_v29 = vmul.f32 -0.5, %v305_v28 }
  0x49   : > { %v307_v31 = vmul.f32 1.442695, %v306_v29  ;;  %v460_v29 = vperm.slane %v699_v19, 0 }
  0x4a   : > { %v359_v5 = vld.sshfl [vmem:[#allocation1] sm:$0xff pattern:$0x75316420]  ;;  %v360_v6 = vld.sshfl [vmem:[#allocation1 + $0x8] sm:$0xff pattern:$0x75316420] }
  0x4b   : > { %341 = vrot.lane.b32.xlu1 %v336_v4, %s986_s23  ;;  %382 = vst [vmem:[#allocation1] ss:$2 sm:$0xff] %v1141_v0  ;;  %363 = vrot.lane.b32.xlu2 %v359_v5, %s987_s21  ;;  %798 = vpow2.f32 %v307_v31  ;;  %s912_s23 = scalar_lea.hbm %s1290_s4, 16 }
  0x4c   : > { %p914_p12 = scmp.lt.s32.totalorder %s912_s23, %s908_s28 }
  0x4e   : > { %p915_p13 = por %p914_p12, %p913_p11 }
  0x50   : > { %p916_p0 = pnand %p915_p13, %p911_p8 }
  0x51   : > { %v1152_v35 = vpop.eup %798 }
  0x52   : > { %v384_v7 = vld.sshfl [vmem:[#allocation1 + $0x8] sm:$0xff pattern:$0x75316420]  ;;  %v383_v8 = vld.sshfl [vmem:[#allocation1] sm:$0xff pattern:$0x75316420]  ;;  %v1157_v38 = vmul.f32 %v1152_v35, %v1152_v35 }
  0x53   : > { %387 = vrot.lane.b32.xlu1 %v383_v8, %s988_s13  ;;  %422 = vst [vmem:[#allocation1] ss:$2 sm:$0xff] %v1141_v0  ;;  %365 = vrot.lane.b32.xlu2 %v360_v6, %s987_s21  ;;  %v420_v37 = vmul.f32 4.0, %v1152_v35  ;;  %v399_v6 = vperm.slane %v697_v61, 1  ;;  %v408_v17 = vperm.slane %v1152_v35, 1 }
  0x54   : > { %v530_v44 = vmul.f32 4.0, %v1157_v38 }
  0x55   : > { %v421_v43 = vadd.f32 1.0, %v420_v37 }
  0x57   : > { %v531_v51 = vadd.f32 %v530_v44, %v421_v43  ;;  %v485_v43 = vperm.slane %v700_v27, 1 }
  0x59   : > { %800 = vrcp.f32 %v531_v51 }
  0x5a   : > { %v424_v9 = vld.sshfl [vmem:[#allocation1 + $0x8] sm:$0xff pattern:$0x75316420]  ;;  %v423_v10 = vld.sshfl [vmem:[#allocation1] sm:$0xff pattern:$0x75316420] }
  0x5b   : > { %429 = vrot.lane.b32.xlu1 %v424_v9, %s989_s22  ;;  %427 = vrot.lane.b32.xlu0 %v423_v10, %s989_s22  ;;  %444 = vst [vmem:[#allocation1] ss:$2 sm:$0xff] %v1141_v0  ;;  %v374_v10 = vperm.slane %v696_v54, 0  ;;  %v508_v54 = vperm.slane %v701_v41, 0 }
  0x5c   : > { %389 = vrot.lane.b32.xlu2 %v384_v7, %s988_s13 }
  0x5f   : > { %v801_v7 = vpop.eup %800 }
  0x60   : > { %v533_v20 = vmul.f32 %v801_v7, %v531_v51 }
  0x62   : > { %v446_v11 = vld.sshfl [vmem:[#allocation1 + $0x8] sm:$0xff pattern:$0x75316420]  ;;  %v445_v12 = vld.sshfl [vmem:[#allocation1] sm:$0xff pattern:$0x75316420] }
  0x63   : > { %451 = vrot.lane.b32.xlu0 %v446_v11, %s990_s25  ;;  %468 = vst [vmem:[#allocation1] ss:$2 sm:$0xff] %v1141_v0  ;;  %v534_v37 = vsub.f32 2.0, %v533_v20 }
  0x64   : > { %449 = vrot.lane.b32.xlu2 %v445_v12, %s990_s25 }
  0x6a   : > { %v470_v13 = vld.sshfl [vmem:[#allocation1 + $0x8] sm:$0xff pattern:$0x75316420]  ;;  %v469_v14 = vld.sshfl [vmem:[#allocation1] sm:$0xff pattern:$0x75316420] }
  0x6b   : > { %475 = vrot.lane.b32.xlu1 %v470_v13, %s991_s26  ;;  %473 = vrot.lane.b32.xlu0 %v469_v14, %s991_s26  ;;  %492 = vst [vmem:[#allocation1] ss:$2 sm:$0xff] %v1141_v0 }
  0x72   : > { %v494_v15 = vld.sshfl [vmem:[#allocation1 + $0x8] sm:$0xff pattern:$0x75316420]  ;;  %v493_v16 = vld.sshfl [vmem:[#allocation1] sm:$0xff pattern:$0x75316420] }
  0x73   : > { %499 = vrot.lane.b32.xlu0 %v494_v15, %s992_s27  ;;  %497 = vrot.lane.b32.xlu2 %v493_v16, %s992_s27  ;;  %v398_v15 = vperm.slane %v697_v61, 0  ;;  %v698_v16 = vsel %vm434_vm12, 1.0, %v993_v47  ;;  %v407_v61 = vperm.slane %v1152_v35, 0 }
  0x74   : > { %v438_v25 = vperm.slane %v698_v16, 0  ;;  %v439_v26 = vperm.slane %v698_v16, 1 }
  0xa5   : > { %v364_v33 = vpop.permute.xlu2 %363 }
  0xad   : > { %v316_v32 = vpop.permute.xlu0 %315  ;;  %v366_v42 = vpop.permute.xlu2 %365 }
  0xae   : > { %v369_v3 = vsel %vm367_vm10, %v366_v42, %v364_v33  ;;  %v368_v13 = vsel %vm367_vm10, %v364_v33, %v366_v42  ;;  %v484_v42 = vperm.slane %v700_v27, 0 }
  0xaf   : > { %v379_v14 = vmul.f32 %v375_v59, %v369_v3  ;;  %v378_v22 = vmul.f32 %v374_v10, %v368_v13 }
  0xb5   : > { %v340_v30 = vpop.permute.xlu1 %339  ;;  %v318_v36 = vpop.permute.xlu0 %317 }
  0xb6   : > { %v322_v55 = vsel %vm321_vm7, %v316_v32, %v318_v36  ;;  %v390_v60 = vpop.permute.xlu2 %389  ;;  %v323_v62 = vsel %vm321_vm7, %v318_v36, %v316_v32 }
  0xb7   : > { %v333_v63 = vmul.f32 %v329_v52, %v322_v55  ;;  %v332_v8 = vmul.f32 %v328_v57, %v323_v62  ;;  %v509_v55 = vperm.slane %v701_v41, 1 }
  0xbd   : > { %v342_v34 = vpop.permute.xlu1 %341 }
  0xbe   : > { %v344_v56 = vsel %vm343_vm8, %v340_v30, %v342_v34  ;;  %v345_v1 = vsel %vm343_vm8, %v342_v34, %v340_v30  ;;  %v450_v23 = vpop.permute.xlu2 %449  ;;  %v461_v30 = vperm.slane %v699_v19, 1 }
  0xbf   : > { %v355_v2 = vmul.f32 %v351_v53, %v344_v56  ;;  %v354_v9 = vmul.f32 %v350_v58, %v345_v1  ;;  %v535_v56 = vmul.f32 %v801_v7, %v534_v37 }
  0xc1   : > { %v357_v12 = vadd.f32 %v355_v2, %v333_v63  ;;  %v356_v21 = vadd.f32 %v354_v9, %v332_v8  ;;  %v519_v2 = vperm.slane %v1157_v38, 1  ;;  %v537_v16 = vperm.slane %v535_v56, 0 }
  0xc3   : > { %v381_v24 = vadd.f32 %v379_v14, %v357_v12  ;;  %v380_v39 = vadd.f32 %v378_v22, %v356_v21 }
  0xc5   : > { %v388_v46 = vpop.permute.xlu1 %387 }
  0xc6   : > { %v393_v11 = vsel %vm391_vm11, %v390_v60, %v388_v46  ;;  %v392_v28 = vsel %vm391_vm11, %v388_v46, %v390_v60 }
  0xc7   : > { %v403_v18 = vmul.f32 %v399_v6, %v393_v11  ;;  %v402_v49 = vmul.f32 %v398_v15, %v392_v28  ;;  %v538_v6 = vperm.slane %v535_v56, 1  ;;  %v518_v11 = vperm.slane %v1157_v38, 0 }
  0xc9   : > { %v405_v33 = vadd.f32 %v403_v18, %v381_v24  ;;  %v404_v62 = vadd.f32 %v402_v49, %v380_v39 }
  0xcb   : > { %v412_v53 = vmul.f32 %v408_v17, %v405_v33  ;;  %v411_v35 = vmul.f32 %v407_v61, %v404_v62  ;;  %v539_v17 = vrot.slane %v538_v6, 4 }
  0xcd   : > { %v1178_v50 = vpop.permute.xlu0 %427  ;;  %v430_v4 = vpop.permute.xlu1 %429  ;;  %v415_v3 = vrot.slane %v412_v53, 4  ;;  %v540_v21 = vsel %vm416_vm4, %v537_v16, %v539_v17 }
  0xce   : > { %v432_v40 = vsel %vm431_vm15, %v1178_v50, %v430_v4  ;;  %v433_v44 = vsel %vm431_vm15, %v430_v4, %v1178_v50  ;;  %v498_v60 = vpop.permute.xlu2 %497 }
  0xcf   : > { %v442_v47 = vmul.f32 %v438_v25, %v433_v44  ;;  %v443_v57 = vmul.f32 %v439_v26, %v432_v40  ;;  %v417_v14 = vsel %vm416_vm4, %v411_v35, %v415_v3 }
  0xd0   : > { %v419_v19 = vadd.f32 %v417_v14, %v1141_v0 }
  0xd5   : > { %v452_v5 = vpop.permute.xlu0 %451 }
  0xd6   : > { %v454_v34 = vsel %vm453_vm0, %v450_v23, %v452_v5  ;;  %v455_v36 = vsel %vm453_vm0, %v452_v5, %v450_v23 }
  0xd7   : > { %v464_v51 = vmul.f32 %v460_v29, %v455_v36  ;;  %v465_v52 = vmul.f32 %v461_v30, %v454_v34 }
  0xd9   : > { %v466_v50 = vadd.f32 %v464_v51, %v442_v47  ;;  %v467_v63 = vadd.f32 %v465_v52, %v443_v57 }
  0xdd   : > { %v476_v31 = vpop.permute.xlu1 %475  ;;  %v474_v32 = vpop.permute.xlu0 %473 }
  0xde   : > { %v478_v46 = vsel %vm477_vm2, %v474_v32, %v476_v31  ;;  %v479_v48 = vsel %vm477_vm2, %v476_v31, %v474_v32 }
  0xdf   : > { %v488_v58 = vmul.f32 %v484_v42, %v478_v46  ;;  %v489_v59 = vmul.f32 %v485_v43, %v479_v48 }
  0xe1   : > { %v490_v7 = vadd.f32 %v488_v58, %v466_v50  ;;  %v491_v8 = vadd.f32 %v489_v59, %v467_v63 }
  0xe5   : > { %v500_v1 = vpop.permute.xlu0 %499 }
  0xe6   : > { %v502_v4 = vsel %vm501_vm3, %v498_v60, %v500_v1  ;;  %v503_v5 = vsel %vm501_vm3, %v500_v1, %v498_v60 }
  0xe7   : > { %v512_v9 = vmul.f32 %v508_v54, %v502_v4  ;;  %v513_v10 = vmul.f32 %v509_v55, %v503_v5 }
  0xe9   : > { %v514_v12 = vadd.f32 %v512_v9, %v490_v7  ;;  %v515_v13 = vadd.f32 %v513_v10, %v491_v8 }
  0xeb   : > { %v523_v15 = vmul.f32 %v519_v2, %v515_v13  ;;  %v522_v45 = vmul.f32 %v518_v11, %v514_v12 }
  0xed   : > { %v526_v18 = vrot.slane %v523_v15, 4 }
  0xef   : > { %v527_v20 = vsel %vm416_vm4, %v522_v45, %v526_v18 }
  0xf0   : > { %v529_v38 = vadd.f32 %v527_v20, %v419_v19 }
  0xf2   : > { %v542_v22 = vmul.f32 %v540_v21, %v529_v38 }
  0xf4   : > { %543 = vst [vmem:[%s286_s24] sm:$0xff] %v542_v22 }
  0xf5   : > { %919 = shalt.err (!%p916_p0)
}
  0xf6   : > { %717 = dma.vmem_to_hbm [thread:$0]  (%p1094_p5), %s561_s2, 128, %s563_s18, %s545_s15  }
  0xf7 PF: > { %s1307_s7 = sld [smem:[#allocation13_spill]]  ;;  %p731_p3 = pnand %p683_p9, %p1064_p6 }
  0xf9   : > { %p732_p7 = pneg %p731_p3 }
  0xfd   : > { %s574_s22 = sand.u32 1, %s1307_s7  }
  0xfe   : > { %s575_s25 = scalar_lea.sflag [#allocation4], %s574_s22 }
  0xff   : > { %957 = dma.done.wait (%p732_p7), %s575_s25, 128  }
 0x100   : > { %959 = vsyncadd (%p732_p7), %s575_s25, 4294967168  ;;  %s23_s20 = sadd.s32 1, %s982_s20   ;;  %s1309_s26 = sld [smem:[#allocation14_spill]] }
 0x101   : > { %p20_p10 = scmp.ge.s32.totalorder %s23_s20, 4   ;;  %s1310_s17 = sld [smem:[#allocation17_spill]] }
 0x102   : > { %s1311_s8 = sld [smem:[#allocation16_spill]]  ;;  %s1312_s15 = smov %s966_s16 }
 0x103   : > { %s1314_s18 = smov %s978_s19 }
 0x104   :  { %22 = sbr.rel (!%p20_p10) target bundleno = 10 (0xa), region = 98 }
 0x106   : > { %s1313_s16 = smov %s1309_s26 }
 0x108   : > { %s1315_s19 = smov %s1311_s8 }
 0x109   :  { %581 = vsyncpa [#allocation3], 1 }
 0x10a   :  { %583 = vsyncpa [#allocation3 + $0x1], 1 }
 0x10b   :  { %584 = vsyncpa [#allocation6], 1 }
 0x10c   :  { %586 = vsyncpa [#allocation6 + $0x1], 1 }
 0x10d   :  { %587 = vsyncpa [#allocation4], 1 }
 0x10e   :  { %589 = vsyncpa [#allocation4 + $0x1], 1 }

</bundles_post_ra>
